<compile_context>
chip_gen: v7x
topology: tpu7x:2x2x1
jax: 0.10.0
libtpu: 0.0.40
codegen_flags: <defaults>
</compile_context>

<pallas_src>
import functools
import math

import jax
import jax.numpy as jnp
from jax.experimental import pallas as pl
from jax.experimental.pallas import tpu as pltpu

EPS = 1e-5          # BatchNorm1d default eps
NEG_SLOPE = 0.2     # LeakyReLU negative slope
LANE = 128          # TPU vreg lane width


def _leaky_relu(x):
    return jnp.where(x > 0, x, NEG_SLOPE * x)


def _batchnorm_fold(x, gamma, beta):
    """Training-mode BatchNorm1d folded into one per-feature scale/shift."""
    mean = jnp.mean(x, axis=0, keepdims=True)
    var = jnp.maximum(jnp.mean(x * x, axis=0, keepdims=True) - mean * mean, 0.0)
    scale = gamma * jax.lax.rsqrt(var + EPS)      # rsqrt -> EUP slot (free-ish)
    shift = beta - mean * scale
    return x * scale + shift


def setop_res_block_kernel(a_ref, b_ref, wab_ref, gab_ref, betab_ref,
                           wres_ref, gres_ref, betares_ref,
                           wout_ref, bout_ref, o_ref, *, layers_num):
    mm_dtype = wab_ref.dtype                      # f32 or bf16 (weights pre-cast)
    a = a_ref[...]
    b = b_ref[...]

    # net_ab: Linear(2D -> D) on cat([a, b], -1) as ONE fused MXU matmul.
    # (Linear bias dropped: it cancels exactly in training-mode BN below.)
    ab = jnp.concatenate([a, b], axis=-1).astype(mm_dtype)
    out = jnp.dot(ab, wab_ref[...], preferred_element_type=jnp.float32)
    out = _leaky_relu(_batchnorm_fold(out, gab_ref[...], betab_ref[...]))

    # res = arithm_op(a, b) == a + b
    res = a + b

    # residual basic blocks: LeakyReLU(BN(Linear(out)) + res)   (pre-BN bias dropped)
    for i in range(layers_num):
        h = jnp.dot(out.astype(mm_dtype), wres_ref[i],
                    preferred_element_type=jnp.float32)
        h = _batchnorm_fold(h, gres_ref[i], betares_ref[i])
        out = _leaky_relu(h + res)

    # fc_out (bias kept: no BN after it). (B, D_pad) lane-dense, unmasked store.
    o_ref[...] = (jnp.dot(out.astype(mm_dtype), wout_ref[...],
                          preferred_element_type=jnp.float32)
                  + bout_ref[...])


def _pad_last(x, to):
    pad = to - x.shape[-1]
    if pad == 0:
        return x
    return jnp.pad(x, [(0, 0)] * (x.ndim - 1) + [(0, pad)])


def _pad_last2(x, rows, cols):
    pr, pc = rows - x.shape[-2], cols - x.shape[-1]
    if pr == 0 and pc == 0:
        return x
    return jnp.pad(x, [(0, 0)] * (x.ndim - 2) + [(0, pr), (0, pc)])


@functools.partial(jax.jit, static_argnames=("layers_num", "use_bf16_matmul"))
def setop_res_block(a, b, params, *, layers_num, use_bf16_matmul=False):
    """a, b: (B, D) single problem, or (P, B, D) stack of independent problems."""
    squeeze = a.ndim == 2
    if squeeze:
        a, b = a[None], b[None]
    P, B, D = a.shape
    L = layers_num
    D_pad = max(LANE, -(-D // LANE) * LANE)

    mm_dtype = jnp.bfloat16 if use_bf16_matmul else jnp.float32

    # --- lane-dense zero padding of activations and parameters (exactly neutral) ---
    a_p = _pad_last(a, D_pad)
    b_p = _pad_last(b, D_pad)
    wab = params["wab"]                                        # (2D, D) == W.T
    wab_p = jnp.concatenate(
        [_pad_last2(wab[:D], D_pad, D_pad),                    # a-half
         _pad_last2(wab[D:], D_pad, D_pad)],                   # b-half
        axis=0).astype(mm_dtype)                               # (2*D_pad, D_pad)
    wres_p = _pad_last2(params["wres"], D_pad, D_pad).astype(mm_dtype)
    wout_p = _pad_last2(params["wout"], D_pad, D_pad).astype(mm_dtype)
    gab_p = _pad_last(params["gab"], D_pad)
    betab_p = _pad_last(params["betab"], D_pad)
    gres_p = _pad_last(params["gres"], D_pad)
    betares_p = _pad_last(params["betares"], D_pad)
    bout_p = _pad_last(params["bout"], D_pad)
    # NOTE: params["bab"] / params["bres"] are intentionally NOT passed to the kernel:
    # a per-feature bias added right before training-mode BatchNorm cancels exactly.

    args = (a_p, b_p, wab_p, gab_p, betab_p,
            wres_p, gres_p, betares_p, wout_p, bout_p)

    def _io_spec():
        return pl.BlockSpec((None, B, D_pad), lambda p: (p, 0, 0))

    def _resident(x):
        ndim = x.ndim

        def idx(p):
            # constant block index -> weight stays VMEM-resident across grid steps
            return (0,) * ndim

        return pl.BlockSpec(x.shape, idx)

    in_specs = [_io_spec(), _io_spec()] + [_resident(x) for x in args[2:]]

    flops = 2 * P * B * D_pad * D_pad * (L + 3)        # net_ab counts double (K=2*D_pad)
    transcendentals = P * (L + 1) * D_pad              # one rsqrt per BN feature
    bytes_accessed = (sum(math.prod(x.shape) * x.dtype.itemsize for x in args)
                      + P * B * D_pad * 4)

    out = pl.pallas_call(
        functools.partial(setop_res_block_kernel, layers_num=L),
        out_shape=jax.ShapeDtypeStruct((P, B, D_pad), jnp.float32),
        grid=(P,),
        in_specs=in_specs,
        out_specs=_io_spec(),
        compiler_params=pltpu.CompilerParams(
            dimension_semantics=("parallel",)),
        cost_estimate=pl.CostEstimate(flops=flops,
                                      transcendentals=transcendentals,
                                      bytes_accessed=bytes_accessed),
    )(*args)

    out = out[..., :D]
    return out[0] if squeeze else out


# ----------------------------- pure-JAX reference -----------------------------

def _batchnorm_ref(x, gamma, beta):
    mean = jnp.mean(x, axis=0, keepdims=True)
    var = jnp.mean((x - mean) ** 2, axis=0, keepdims=True)
    return (x - mean) * jax.lax.rsqrt(var + EPS) * gamma + beta


def setop_res_block_ref(a, b, params, layers_num):
    """Mirrors the PyTorch forward (f32, biases included) for one (B, D) problem."""
    out = jnp.concatenate([a, b], axis=-1) @ params["wab"] + params["bab"]
    out = _leaky_relu(_batchnorm_ref(out, params["gab"], params["betab"]))
    res = a + b
    for i in range(layers_num):
        h = out @ params["wres"][i] + params["bres"][i]
        h = _batchnorm_ref(h, params["gres"][i], params["betares"][i])
        out = _leaky_relu(h + res)
    return out @ params["wout"] + params["bout"]


def init_params(key, input_dim, layers_num):
    D, L = input_dim, layers_num
    k = jax.random.split(key, 10)
    s = 0.1
    return {
        # net_ab Linear(2D, D): stored as W.T with shape (2D, D)
        "wab": s * jax.random.normal(k[0], (2 * D, D), jnp.float32),
        "bab": s * jax.random.normal(k[1], (1, D), jnp.float32),
        "gab": 1.0 + s * jax.random.normal(k[2], (1, D), jnp.float32),
        "betab": s * jax.random.normal(k[3], (1, D), jnp.float32),
        # residual layers (stacked)
        "wres": s * jax.random.normal(k[4], (L, D, D), jnp.float32),
        "bres": s * jax.random.normal(k[5], (L, 1, D), jnp.float32),
        "gres": 1.0 + s * jax.random.normal(k[6], (L, 1, D), jnp.float32),
        "betares": s * jax.random.normal(k[7], (L, 1, D), jnp.float32),
        # fc_out
        "wout": s * jax.random.normal(k[8], (D, D), jnp.float32),
        "bout": s * jax.random.normal(k[9], (1, D), jnp.float32),
    }


if __name__ == "__main__":
    P, B, D, L = 2, 8, 32, 2   # independent problems, batch, latent dim, residual layers

    key = jax.random.PRNGKey(0)
    ka, kb, kp = jax.random.split(key, 3)
    a = jax.random.normal(ka, (P, B, D), jnp.float32)
    b = jax.random.normal(kb, (P, B, D), jnp.float32)
    params = init_params(kp, D, L)

    ref = jax.vmap(lambda x, y: setop_res_block_ref(x, y, params, L))(a, b)

    # f32 matmul path (exact up to fp reassociation).
    out = jax.block_until_ready(setop_res_block(a, b, params, layers_num=L))
    assert out.shape == (P, B, D)
    assert jnp.allclose(out, ref, atol=1e-3, rtol=1e-3), "f32 kernel mismatch vs reference"

    # Single-problem (B, D) call path.
    out_single = jax.block_until_ready(setop_res_block(a[0], b[0], params, layers_num=L))
    assert out_single.shape == (B, D)
    assert jnp.allclose(out_single, ref[0], atol=1e-3, rtol=1e-3), "2D-call mismatch"

    # bf16 matmul path (MXU-native on v6e/v7x); elementwise math stays f32.
    out_bf16 = jax.block_until_ready(
        setop_res_block(a, b, params, layers_num=L, use_bf16_matmul=True))
    assert jnp.allclose(out_bf16, ref, atol=1e-1, rtol=1e-1), "bf16 kernel mismatch vs reference"

    print("KERNEL_OK")
</pallas_src>

<mosaic_0001>
module attributes {stable_mosaic.version = 11 : i64} {
  func.func @setop_res_block_kernel(%arg0: i32, %arg1: memref<1x8x128xf32, #tpu.memory_space<vmem>>, %arg2: memref<1x8x128xf32, #tpu.memory_space<vmem>>, %arg3: memref<256x128xf32, #tpu.memory_space<vmem>>, %arg4: memref<1x128xf32, #tpu.memory_space<vmem>>, %arg5: memref<1x128xf32, #tpu.memory_space<vmem>>, %arg6: memref<2x128x128xf32, #tpu.memory_space<vmem>>, %arg7: memref<2x1x128xf32, #tpu.memory_space<vmem>>, %arg8: memref<2x1x128xf32, #tpu.memory_space<vmem>>, %arg9: memref<128x128xf32, #tpu.memory_space<vmem>>, %arg10: memref<1x128xf32, #tpu.memory_space<vmem>>, %arg11: memref<1x8x128xf32, #tpu.memory_space<vmem>>) attributes {dimension_semantics = [#tpu.dimension_semantics<parallel>], iteration_bounds = array<i64: 2>, scalar_prefetch = 0 : i64, scratch_operands = 0 : i64, tpu.core_type = #tpu.core_type<tc>, window_params = [{transform_indices = @transform_0, window_bounds = array<i64: 1, 8, 128>}, {transform_indices = @transform_1, window_bounds = array<i64: 1, 8, 128>}, {pipeline_mode = #tpu.pipeline_mode<synchronous>, transform_indices = @transform_2, window_bounds = array<i64: 256, 128>}, {pipeline_mode = #tpu.pipeline_mode<synchronous>, transform_indices = @transform_3, window_bounds = array<i64: 1, 128>}, {pipeline_mode = #tpu.pipeline_mode<synchronous>, transform_indices = @transform_4, window_bounds = array<i64: 1, 128>}, {pipeline_mode = #tpu.pipeline_mode<synchronous>, transform_indices = @transform_5, window_bounds = array<i64: 2, 128, 128>}, {pipeline_mode = #tpu.pipeline_mode<synchronous>, transform_indices = @transform_6, window_bounds = array<i64: 2, 1, 128>}, {pipeline_mode = #tpu.pipeline_mode<synchronous>, transform_indices = @transform_7, window_bounds = array<i64: 2, 1, 128>}, {pipeline_mode = #tpu.pipeline_mode<synchronous>, transform_indices = @transform_8, window_bounds = array<i64: 128, 128>}, {pipeline_mode = #tpu.pipeline_mode<synchronous>, transform_indices = @transform_9, window_bounds = array<i64: 1, 128>}, {transform_indices = @transform_10, window_bounds = array<i64: 1, 8, 128>}]} {
    %c0 = arith.constant 0 : index
    %c0_0 = arith.constant 0 : index
    %c0_1 = arith.constant 0 : index
    %0 = vector.load %arg1[%c0, %c0_0, %c0_1] : memref<1x8x128xf32, #tpu.memory_space<vmem>>, vector<1x8x128xf32>
    %1 = vector.shape_cast %0 : vector<1x8x128xf32> to vector<8x128xf32>
    %c0_2 = arith.constant 0 : index
    %c0_3 = arith.constant 0 : index
    %c0_4 = arith.constant 0 : index
    %2 = vector.load %arg2[%c0_2, %c0_3, %c0_4] : memref<1x8x128xf32, #tpu.memory_space<vmem>>, vector<1x8x128xf32>
    %3 = vector.shape_cast %2 : vector<1x8x128xf32> to vector<8x128xf32>
    %4 = tpu.concatenate %1, %3 in 1 : vector<8x128xf32>, vector<8x128xf32> -> vector<8x256xf32>
    %c0_5 = arith.constant 0 : index
    %c0_6 = arith.constant 0 : index
    %5 = vector.load %arg3[%c0_5, %c0_6] : memref<256x128xf32, #tpu.memory_space<vmem>>, vector<256x128xf32>
    %cst = arith.constant dense<0.000000e+00> : vector<8x128xf32>
    %6 = tpu.matmul %4, %5, %cst {dimension_numbers = #tpu.dot_dimension_numbers<[1], [0], [0], [1], [0, 0, 1, 1], [], []>} : vector<8x256xf32>, vector<256x128xf32>, vector<8x128xf32> -> vector<8x128xf32>
    %c0_7 = arith.constant 0 : index
    %c0_8 = arith.constant 0 : index
    %7 = vector.load %arg4[%c0_7, %c0_8] : memref<1x128xf32, #tpu.memory_space<vmem>>, vector<1x128xf32>
    %c0_9 = arith.constant 0 : index
    %c0_10 = arith.constant 0 : index
    %8 = vector.load %arg5[%c0_9, %c0_10] : memref<1x128xf32, #tpu.memory_space<vmem>>, vector<1x128xf32>
    %cst_11 = arith.constant dense<0.000000e+00> : vector<128xf32>
    %9 = vector.multi_reduction <add>, %6, %cst_11 [0] : vector<8x128xf32> to vector<128xf32>
    %10 = vector.shape_cast %9 : vector<128xf32> to vector<1x128xf32>
    %cst_12 = arith.constant 8.000000e+00 : f32
    %11 = vector.broadcast %cst_12 : f32 to vector<1x128xf32>
    %12 = arith.divf %10, %11 : vector<1x128xf32>
    %13 = arith.mulf %6, %6 : vector<8x128xf32>
    %cst_13 = arith.constant dense<0.000000e+00> : vector<128xf32>
    %14 = vector.multi_reduction <add>, %13, %cst_13 [0] : vector<8x128xf32> to vector<128xf32>
    %15 = vector.shape_cast %14 : vector<128xf32> to vector<1x128xf32>
    %cst_14 = arith.constant 8.000000e+00 : f32
    %16 = vector.broadcast %cst_14 : f32 to vector<1x128xf32>
    %17 = arith.divf %15, %16 : vector<1x128xf32>
    %18 = arith.mulf %12, %12 : vector<1x128xf32>
    %19 = arith.subf %17, %18 : vector<1x128xf32>
    %cst_15 = arith.constant 0.000000e+00 : f32
    %20 = vector.broadcast %cst_15 : f32 to vector<1x128xf32>
    %21 = arith.maximumf %19, %20 : vector<1x128xf32>
    %cst_16 = arith.constant 9.99999974E-6 : f32
    %22 = vector.broadcast %cst_16 : f32 to vector<1x128xf32>
    %23 = arith.addf %21, %22 : vector<1x128xf32>
    %24 = math.rsqrt %23 : vector<1x128xf32>
    %25 = arith.mulf %7, %24 : vector<1x128xf32>
    %26 = arith.mulf %12, %25 : vector<1x128xf32>
    %27 = arith.subf %8, %26 : vector<1x128xf32>
    %28 = vector.broadcast %25 : vector<1x128xf32> to vector<8x128xf32>
    %29 = arith.mulf %6, %28 : vector<8x128xf32>
    %30 = vector.broadcast %27 : vector<1x128xf32> to vector<8x128xf32>
    %31 = arith.addf %29, %30 : vector<8x128xf32>
    %cst_17 = arith.constant 0.000000e+00 : f32
    %32 = vector.broadcast %cst_17 : f32 to vector<8x128xf32>
    %33 = arith.cmpf ogt, %31, %32 : vector<8x128xf32>
    %cst_18 = arith.constant 2.000000e-01 : f32
    %34 = vector.broadcast %cst_18 : f32 to vector<8x128xf32>
    %35 = arith.mulf %34, %31 : vector<8x128xf32>
    %36 = arith.select %33, %31, %35 : vector<8x128xi1>, vector<8x128xf32>
    %37 = arith.addf %1, %3 : vector<8x128xf32>
    %c0_19 = arith.constant 0 : index
    %c0_20 = arith.constant 0 : index
    %c0_21 = arith.constant 0 : index
    %38 = vector.load %arg6[%c0_19, %c0_20, %c0_21] : memref<2x128x128xf32, #tpu.memory_space<vmem>>, vector<1x128x128xf32>
    %39 = vector.shape_cast %38 : vector<1x128x128xf32> to vector<128x128xf32>
    %cst_22 = arith.constant dense<0.000000e+00> : vector<8x128xf32>
    %40 = tpu.matmul %36, %39, %cst_22 {dimension_numbers = #tpu.dot_dimension_numbers<[1], [0], [0], [1], [0, 0, 1, 1], [], []>} : vector<8x128xf32>, vector<128x128xf32>, vector<8x128xf32> -> vector<8x128xf32>
    %c0_23 = arith.constant 0 : index
    %c0_24 = arith.constant 0 : index
    %c0_25 = arith.constant 0 : index
    %41 = vector.load %arg7[%c0_23, %c0_24, %c0_25] : memref<2x1x128xf32, #tpu.memory_space<vmem>>, vector<1x1x128xf32>
    %42 = vector.shape_cast %41 : vector<1x1x128xf32> to vector<1x128xf32>
    %c0_26 = arith.constant 0 : index
    %c0_27 = arith.constant 0 : index
    %c0_28 = arith.constant 0 : index
    %43 = vector.load %arg8[%c0_26, %c0_27, %c0_28] : memref<2x1x128xf32, #tpu.memory_space<vmem>>, vector<1x1x128xf32>
    %44 = vector.shape_cast %43 : vector<1x1x128xf32> to vector<1x128xf32>
    %cst_29 = arith.constant dense<0.000000e+00> : vector<128xf32>
    %45 = vector.multi_reduction <add>, %40, %cst_29 [0] : vector<8x128xf32> to vector<128xf32>
    %46 = vector.shape_cast %45 : vector<128xf32> to vector<1x128xf32>
    %cst_30 = arith.constant 8.000000e+00 : f32
    %47 = vector.broadcast %cst_30 : f32 to vector<1x128xf32>
    %48 = arith.divf %46, %47 : vector<1x128xf32>
    %49 = arith.mulf %40, %40 : vector<8x128xf32>
    %cst_31 = arith.constant dense<0.000000e+00> : vector<128xf32>
    %50 = vector.multi_reduction <add>, %49, %cst_31 [0] : vector<8x128xf32> to vector<128xf32>
    %51 = vector.shape_cast %50 : vector<128xf32> to vector<1x128xf32>
    %cst_32 = arith.constant 8.000000e+00 : f32
    %52 = vector.broadcast %cst_32 : f32 to vector<1x128xf32>
    %53 = arith.divf %51, %52 : vector<1x128xf32>
    %54 = arith.mulf %48, %48 : vector<1x128xf32>
    %55 = arith.subf %53, %54 : vector<1x128xf32>
    %cst_33 = arith.constant 0.000000e+00 : f32
    %56 = vector.broadcast %cst_33 : f32 to vector<1x128xf32>
    %57 = arith.maximumf %55, %56 : vector<1x128xf32>
    %cst_34 = arith.constant 9.99999974E-6 : f32
    %58 = vector.broadcast %cst_34 : f32 to vector<1x128xf32>
    %59 = arith.addf %57, %58 : vector<1x128xf32>
    %60 = math.rsqrt %59 : vector<1x128xf32>
    %61 = arith.mulf %42, %60 : vector<1x128xf32>
    %62 = arith.mulf %48, %61 : vector<1x128xf32>
    %63 = arith.subf %44, %62 : vector<1x128xf32>
    %64 = vector.broadcast %61 : vector<1x128xf32> to vector<8x128xf32>
    %65 = arith.mulf %40, %64 : vector<8x128xf32>
    %66 = vector.broadcast %63 : vector<1x128xf32> to vector<8x128xf32>
    %67 = arith.addf %65, %66 : vector<8x128xf32>
    %68 = arith.addf %67, %37 : vector<8x128xf32>
    %cst_35 = arith.constant 0.000000e+00 : f32
    %69 = vector.broadcast %cst_35 : f32 to vector<8x128xf32>
    %70 = arith.cmpf ogt, %68, %69 : vector<8x128xf32>
    %cst_36 = arith.constant 2.000000e-01 : f32
    %71 = vector.broadcast %cst_36 : f32 to vector<8x128xf32>
    %72 = arith.mulf %71, %68 : vector<8x128xf32>
    %73 = arith.select %70, %68, %72 : vector<8x128xi1>, vector<8x128xf32>
    %c1 = arith.constant 1 : index
    %c0_37 = arith.constant 0 : index
    %c0_38 = arith.constant 0 : index
    %74 = vector.load %arg6[%c1, %c0_37, %c0_38] : memref<2x128x128xf32, #tpu.memory_space<vmem>>, vector<1x128x128xf32>
    %75 = vector.shape_cast %74 : vector<1x128x128xf32> to vector<128x128xf32>
    %cst_39 = arith.constant dense<0.000000e+00> : vector<8x128xf32>
    %76 = tpu.matmul %73, %75, %cst_39 {dimension_numbers = #tpu.dot_dimension_numbers<[1], [0], [0], [1], [0, 0, 1, 1], [], []>} : vector<8x128xf32>, vector<128x128xf32>, vector<8x128xf32> -> vector<8x128xf32>
    %c1_40 = arith.constant 1 : index
    %c0_41 = arith.constant 0 : index
    %c0_42 = arith.constant 0 : index
    %77 = vector.load %arg7[%c1_40, %c0_41, %c0_42] : memref<2x1x128xf32, #tpu.memory_space<vmem>>, vector<1x1x128xf32>
    %78 = vector.shape_cast %77 : vector<1x1x128xf32> to vector<1x128xf32>
    %c1_43 = arith.constant 1 : index
    %c0_44 = arith.constant 0 : index
    %c0_45 = arith.constant 0 : index
    %79 = vector.load %arg8[%c1_43, %c0_44, %c0_45] : memref<2x1x128xf32, #tpu.memory_space<vmem>>, vector<1x1x128xf32>
    %80 = vector.shape_cast %79 : vector<1x1x128xf32> to vector<1x128xf32>
    %cst_46 = arith.constant dense<0.000000e+00> : vector<128xf32>
    %81 = vector.multi_reduction <add>, %76, %cst_46 [0] : vector<8x128xf32> to vector<128xf32>
    %82 = vector.shape_cast %81 : vector<128xf32> to vector<1x128xf32>
    %cst_47 = arith.constant 8.000000e+00 : f32
    %83 = vector.broadcast %cst_47 : f32 to vector<1x128xf32>
    %84 = arith.divf %82, %83 : vector<1x128xf32>
    %85 = arith.mulf %76, %76 : vector<8x128xf32>
    %cst_48 = arith.constant dense<0.000000e+00> : vector<128xf32>
    %86 = vector.multi_reduction <add>, %85, %cst_48 [0] : vector<8x128xf32> to vector<128xf32>
    %87 = vector.shape_cast %86 : vector<128xf32> to vector<1x128xf32>
    %cst_49 = arith.constant 8.000000e+00 : f32
    %88 = vector.broadcast %cst_49 : f32 to vector<1x128xf32>
    %89 = arith.divf %87, %88 : vector<1x128xf32>
    %90 = arith.mulf %84, %84 : vector<1x128xf32>
    %91 = arith.subf %89, %90 : vector<1x128xf32>
    %cst_50 = arith.constant 0.000000e+00 : f32
    %92 = vector.broadcast %cst_50 : f32 to vector<1x128xf32>
    %93 = arith.maximumf %91, %92 : vector<1x128xf32>
    %cst_51 = arith.constant 9.99999974E-6 : f32
    %94 = vector.broadcast %cst_51 : f32 to vector<1x128xf32>
    %95 = arith.addf %93, %94 : vector<1x128xf32>
    %96 = math.rsqrt %95 : vector<1x128xf32>
    %97 = arith.mulf %78, %96 : vector<1x128xf32>
    %98 = arith.mulf %84, %97 : vector<1x128xf32>
    %99 = arith.subf %80, %98 : vector<1x128xf32>
    %100 = vector.broadcast %97 : vector<1x128xf32> to vector<8x128xf32>
    %101 = arith.mulf %76, %100 : vector<8x128xf32>
    %102 = vector.broadcast %99 : vector<1x128xf32> to vector<8x128xf32>
    %103 = arith.addf %101, %102 : vector<8x128xf32>
    %104 = arith.addf %103, %37 : vector<8x128xf32>
    %cst_52 = arith.constant 0.000000e+00 : f32
    %105 = vector.broadcast %cst_52 : f32 to vector<8x128xf32>
    %106 = arith.cmpf ogt, %104, %105 : vector<8x128xf32>
    %cst_53 = arith.constant 2.000000e-01 : f32
    %107 = vector.broadcast %cst_53 : f32 to vector<8x128xf32>
    %108 = arith.mulf %107, %104 : vector<8x128xf32>
    %109 = arith.select %106, %104, %108 : vector<8x128xi1>, vector<8x128xf32>
    %c0_54 = arith.constant 0 : index
    %c0_55 = arith.constant 0 : index
    %110 = vector.load %arg9[%c0_54, %c0_55] : memref<128x128xf32, #tpu.memory_space<vmem>>, vector<128x128xf32>
    %cst_56 = arith.constant dense<0.000000e+00> : vector<8x128xf32>
    %111 = tpu.matmul %109, %110, %cst_56 {dimension_numbers = #tpu.dot_dimension_numbers<[1], [0], [0], [1], [0, 0, 1, 1], [], []>} : vector<8x128xf32>, vector<128x128xf32>, vector<8x128xf32> -> vector<8x128xf32>
    %c0_57 = arith.constant 0 : index
    %c0_58 = arith.constant 0 : index
    %112 = vector.load %arg10[%c0_57, %c0_58] : memref<1x128xf32, #tpu.memory_space<vmem>>, vector<1x128xf32>
    %113 = vector.broadcast %112 : vector<1x128xf32> to vector<8x128xf32>
    %114 = arith.addf %111, %113 : vector<8x128xf32>
    %c0_59 = arith.constant 0 : index
    %c0_60 = arith.constant 0 : index
    %c0_61 = arith.constant 0 : index
    %115 = vector.load %arg11[%c0_59, %c0_60, %c0_61] : memref<1x8x128xf32, #tpu.memory_space<vmem>>, vector<1x8x128xf32>
    %116 = vector.shape_cast %115 : vector<1x8x128xf32> to vector<8x128xf32>
    %117 = vector.shape_cast %114 : vector<8x128xf32> to vector<1x8x128xf32>
    tpu.vector_store %arg11[%c0_59, %c0_60, %c0_61], %117 {strides = array<i32>} : memref<1x8x128xf32, #tpu.memory_space<vmem>>, vector<1x8x128xf32>,
    return
  }
  func.func @transform_0(%arg0: i32) -> (i32, i32, i32) {
    %c0_i32 = arith.constant 0 : i32
    %c0_i32_0 = arith.constant 0 : i32
    %c0_i32_1 = arith.constant 0 : i32
    return %arg0, %c0_i32, %c0_i32_0 : i32, i32, i32
  }
  func.func @transform_1(%arg0: i32) -> (i32, i32, i32) {
    %c0_i32 = arith.constant 0 : i32
    %c0_i32_0 = arith.constant 0 : i32
    %c0_i32_1 = arith.constant 0 : i32
    return %arg0, %c0_i32, %c0_i32_0 : i32, i32, i32
  }
  func.func @transform_2(%arg0: i32) -> (i32, i32) {
    %c0_i32 = arith.constant 0 : i32
    %c0_i32_0 = arith.constant 0 : i32
    %c0_i32_1 = arith.constant 0 : i32
    return %c0_i32, %c0_i32_0 : i32, i32
  }
  func.func @transform_3(%arg0: i32) -> (i32, i32) {
    %c0_i32 = arith.constant 0 : i32
    %c0_i32_0 = arith.constant 0 : i32
    %c0_i32_1 = arith.constant 0 : i32
    return %c0_i32, %c0_i32_0 : i32, i32
  }
  func.func @transform_4(%arg0: i32) -> (i32, i32) {
    %c0_i32 = arith.constant 0 : i32
    %c0_i32_0 = arith.constant 0 : i32
    %c0_i32_1 = arith.constant 0 : i32
    return %c0_i32, %c0_i32_0 : i32, i32
  }
  func.func @transform_5(%arg0: i32) -> (i32, i32, i32) {
    %c0_i32 = arith.constant 0 : i32
    %c0_i32_0 = arith.constant 0 : i32
    %c0_i32_1 = arith.constant 0 : i32
    %c0_i32_2 = arith.constant 0 : i32
    return %c0_i32, %c0_i32_0, %c0_i32_1 : i32, i32, i32
  }
  func.func @transform_6(%arg0: i32) -> (i32, i32, i32) {
    %c0_i32 = arith.constant 0 : i32
    %c0_i32_0 = arith.constant 0 : i32
    %c0_i32_1 = arith.constant 0 : i32
    %c0_i32_2 = arith.constant 0 : i32
    return %c0_i32, %c0_i32_0, %c0_i32_1 : i32, i32, i32
  }
  func.func @transform_7(%arg0: i32) -> (i32, i32, i32) {
    %c0_i32 = arith.constant 0 : i32
    %c0_i32_0 = arith.constant 0 : i32
    %c0_i32_1 = arith.constant 0 : i32
    %c0_i32_2 = arith.constant 0 : i32
    return %c0_i32, %c0_i32_0, %c0_i32_1 : i32, i32, i32
  }
  func.func @transform_8(%arg0: i32) -> (i32, i32) {
    %c0_i32 = arith.constant 0 : i32
    %c0_i32_0 = arith.constant 0 : i32
    %c0_i32_1 = arith.constant 0 : i32
    return %c0_i32, %c0_i32_0 : i32, i32
  }
  func.func @transform_9(%arg0: i32) -> (i32, i32) {
    %c0_i32 = arith.constant 0 : i32
    %c0_i32_0 = arith.constant 0 : i32
    %c0_i32_1 = arith.constant 0 : i32
    return %c0_i32, %c0_i32_0 : i32, i32
  }
  func.func @transform_10(%arg0: i32) -> (i32, i32, i32) {
    %c0_i32 = arith.constant 0 : i32
    %c0_i32_0 = arith.constant 0 : i32
    %c0_i32_1 = arith.constant 0 : i32
    return %arg0, %c0_i32, %c0_i32_0 : i32, i32, i32
  }
}

</mosaic_0001>

<bundles_post_ra>
// kernel: setop_res_block.1
= control target key start
LH: loop header
LB: loop body
LE: loop exit
PB: predicated region body
PF: predicated region fallthrough
CT: control target
= control target key end

     0   :  { %15 = vsyncpa [#allocation3], 0  ;;  %s1862_s0 = inlined_call_operand.vmem [shape: f32[2,8,128], index: 0, kind: input, shape index: {}]   ;;  %s1863_s1 = inlined_call_operand.vmem [shape: f32[2,8,128], index: 1, kind: input, shape index: {}]   ;;  %s1864_s2 = inlined_call_operand.vmem [shape: f32[256,128], index: 2, kind: input, shape index: {}]   ;;  %s1865_s3 = inlined_call_operand.vmem [shape: f32[1,128], index: 3, kind: input, shape index: {}]   ;;  %s1866_s4 = inlined_call_operand.vmem [shape: f32[1,128], index: 4, kind: input, shape index: {}]   ;;  %s1867_s5 = inlined_call_operand.vmem [shape: f32[2,128,128], index: 5, kind: input, shape index: {}]   ;;  %s1868_s6 = inlined_call_operand.vmem [shape: f32[2,1,128], index: 6, kind: input, shape index: {}]   ;;  %s1869_s7 = inlined_call_operand.vmem [shape: f32[2,1,128], index: 7, kind: input, shape index: {}]   ;;  %s1870_s8 = inlined_call_operand.vmem [shape: f32[128,128], index: 8, kind: input, shape index: {}]   ;;  %s1871_s9 = inlined_call_operand.vmem [shape: f32[1,128], index: 9, kind: input, shape index: {}]   ;;  %s1872_s10 = inlined_call_operand.hbm [shape: f32[2,8,128], index: 10, kind: output, shape index: {}]  }
   0x1   :  { %17 = vsyncpa [#allocation3 + $0x1], 0  ;;  %s1456_s13 = smov 0   ;;  %s1458_s14 = smov 0  }
   0x2   :  { %s1460_s15 = smov 0   ;;  %s1462_s16 = smov 0  }
   0x3 LB: > { %1874 = sst [smem:[#allocation5_spill]] %s1391_s15  ;;  %s1477_s17 = sadd.s32 4294967295, %s1395_s16   ;;  %s1395_s16 = sphi %s1462_s16, %s1882_s16   ;;  %s1391_s15 = sphi %s1460_s15, %s1879_s15   ;;  %s1387_s14 = sphi %s1458_s14, %s1881_s14   ;;  %s1383_s13 = sphi %s1456_s13, %s1880_s13  }
   0x4   : > { %s960_s18 = sadd.s32 4294967294, %s1395_s16   ;;  %s1481_s19 = sadd.s32 1, %s1395_s16  }
   0x5   : > { %s250_s20 = sadd.s32 1, %s1391_s15  ;;  %s247_s21 = ssub.s32 %s1395_s16, %s1481_s19 }
   0x6   : > { %p260_p0 = scmp.ne.s32.totalorder %s1391_s15, %s1387_s14  ;;  %p248_p1 = scmp.eq.s32.totalorder %s247_s21, 0 }
   0x7   : > { %p261_p2 = scmp.eq.s32.totalorder %s1477_s17, 1  ;;  %p266_p3 = scmp.ne.s32.totalorder %s1387_s14, %s1383_s13 }
   0x8   : > { %p267_p4 = scmp.eq.s32.totalorder %s960_s18, 1  ;;  %p963_p7 = scmp.ge.s32.totalorder %s1395_s16, 1 }
   0x9   : > { %s1492_s22 = scalar_select %p248_p1, %s1391_s15, %s250_s20  }
   0xa   : > { %p1494_p5 = por %p261_p2, %p260_p0  ;;  %p1498_p6 = por %p267_p4, %p266_p3 }
   0xb   : > { %1875 = sst [smem:[#allocation6_spill]] %s1492_s22  ;;  %p323_p8 = scmp.lt.s32.totalorder %s1395_s16, 3 }
   0xd   : > { %p324_p9 = pnand %p963_p7, %p323_p8 }
   0xe   : > { %v390_v0 = vld [vmem:[%s1864_s2 + $0x80] sm:$0xff] (!%p324_p9)  ;;  %v391_v1 = vld [vmem:[%s1864_s2 + $0x88] sm:$0xff] (!%p324_p9)  ;;  %p364_p10 = scmp.lt.s32.totalorder (!%p324_p9), %s1477_s17, 1  ;;  %v392_v5 = vld [vmem:[%s1864_s2 + $0x90] sm:$0xff] (!%p324_p9)  ;;  %v1397_v54 = vmov (!%p324_p9), 0.0|0.0   ;;  %vm1398_vm0 = vmmov (!%p324_p9), 0  }
   0xf   : > { %327 = sbr.rel (%p324_p9) target bundleno = 1058 (0x422), region = 60  ;;  %v374_v2 = vld [vmem:[%s1864_s2] sm:$0xff] (!%p324_p9)  ;;  %v1181_v3 = vpack.c.bf16 (!%p324_p9), %v391_v1, %v390_v0  ;;  %v375_v4 = vld [vmem:[%s1864_s2 + $0x8] sm:$0xff] (!%p324_p9)  ;;  %v393_v6 = vld [vmem:[%s1864_s2 + $0x98] sm:$0xff] (!%p324_p9)  ;;  %1213 = vmatprep.subr.bf16.mxu1 (!%p324_p9), %v1397_v54  ;;  %v1399_v0 = vmov (!%p324_p9), 0.0   ;;  %s987_s18 = sshll.u32 (!%p324_p9), %s1477_s17, 7 }
  0x10   : > { %v1183_v7 = vpack.c.bf16 (!%p324_p9), %v375_v4, %v374_v2  ;;  %v1185_v8 = vpack.c.bf16 (!%p324_p9), %v393_v6, %v392_v5  ;;  %v376_v9 = vld [vmem:[%s1864_s2 + $0x10] sm:$0xff] (!%p324_p9)  ;;  %v377_v10 = vld [vmem:[%s1864_s2 + $0x18] sm:$0xff] (!%p324_p9)  ;;  %v394_v11 = vld [vmem:[%s1864_s2 + $0xa0] sm:$0xff] (!%p324_p9)  ;;  %1108 = vmatprep.mubr.msk.f32.mxu1 (!%p324_p9), %vm1398_vm0, %v1399_v0  ;;  %s1820_s25 = scalar_lea.hbm (!%p324_p9), %s1872_s10, %s987_s18 }
  0x11   : > { %1182 = vmatprep.subr.bf16.mxu0 (!%p324_p9), %v1181_v3  ;;  %v395_v12 = vld [vmem:[%s1864_s2 + $0xa8] sm:$0xff] (!%p324_p9)  ;;  %v1187_v13 = vpack.c.bf16 (!%p324_p9), %v377_v10, %v376_v9  ;;  %v378_v15 = vld [vmem:[%s1864_s2 + $0x20] sm:$0xff] (!%p324_p9)  ;;  %v396_v17 = vld [vmem:[%s1864_s2 + $0xb0] sm:$0xff] (!%p324_p9) }
  0x12   : > { %1184 = vmatpush3.bf16.msra.mxu0 (!%p324_p9), %v1183_v7  ;;  %v1189_v14 = vpack.c.bf16 (!%p324_p9), %v395_v12, %v394_v11  ;;  %v379_v16 = vld [vmem:[%s1864_s2 + $0x28] sm:$0xff] (!%p324_p9)  ;;  %v397_v18 = vld [vmem:[%s1864_s2 + $0xb8] sm:$0xff] (!%p324_p9)  ;;  %v380_v21 = vld [vmem:[%s1864_s2 + $0x30] sm:$0xff] (!%p324_p9) }
  0x13   : > { %1186 = vmatprep.subr.bf16.mxu0 (!%p324_p9), %v1185_v8  ;;  %v1191_v19 = vpack.c.bf16 (!%p324_p9), %v379_v16, %v378_v15  ;;  %v1193_v20 = vpack.c.bf16 (!%p324_p9), %v397_v18, %v396_v17  ;;  %v381_v22 = vld [vmem:[%s1864_s2 + $0x38] sm:$0xff] (!%p324_p9)  ;;  %v398_v23 = vld [vmem:[%s1864_s2 + $0xc0] sm:$0xff] (!%p324_p9)  ;;  %v399_v24 = vld [vmem:[%s1864_s2 + $0xc8] sm:$0xff] (!%p324_p9) }
  0x14   : > { %v1195_v27 = vpack.c.bf16 (!%p324_p9), %v381_v22, %v380_v21  ;;  %v1197_v29 = vpack.c.bf16 (!%p324_p9), %v399_v24, %v398_v23  ;;  %v382_v30 = vld [vmem:[%s1864_s2 + $0x40] sm:$0xff] (!%p324_p9)  ;;  %v383_v31 = vld [vmem:[%s1864_s2 + $0x48] sm:$0xff] (!%p324_p9)  ;;  %v400_v32 = vld [vmem:[%s1864_s2 + $0xd0] sm:$0xff] (!%p324_p9) }
  0x15   : > { %v401_v33 = vld [vmem:[%s1864_s2 + $0xd8] sm:$0xff] (!%p324_p9)  ;;  %v1199_v34 = vpack.c.bf16 (!%p324_p9), %v383_v31, %v382_v30  ;;  %v384_v36 = vld [vmem:[%s1864_s2 + $0x50] sm:$0xff] (!%p324_p9)  ;;  %v402_v38 = vld [vmem:[%s1864_s2 + $0xe0] sm:$0xff] (!%p324_p9) }
  0x16   : > { %s365_s12 = scalar_select %p364_p10, %s1477_s17, 1  ;;  %1188 = vmatpush3.bf16.msra.mxu0 %v1187_v13  ;;  %v1201_v35 = vpack.c.bf16 %v401_v33, %v400_v32  ;;  %v385_v37 = vld [vmem:[%s1864_s2 + $0x58] sm:$0xff]  ;;  %v403_v39 = vld [vmem:[%s1864_s2 + $0xe8] sm:$0xff]  ;;  %v386_v42 = vld [vmem:[%s1864_s2 + $0x60] sm:$0xff] }
  0x17   : > { %1190 = vmatprep.subr.bf16.mxu0 %v1189_v14  ;;  %v1203_v40 = vpack.c.bf16 %v385_v37, %v384_v36  ;;  %v1205_v41 = vpack.c.bf16 %v403_v39, %v402_v38  ;;  %v387_v43 = vld [vmem:[%s1864_s2 + $0x68] sm:$0xff]  ;;  %v404_v44 = vld [vmem:[%s1864_s2 + $0xf0] sm:$0xff]  ;;  %v405_v45 = vld [vmem:[%s1864_s2 + $0xf8] sm:$0xff]  ;;  %v503_v36 = vlaneseq  ;;  %s1400_s17 = smov [#allocation2]  }
  0x18   : > { %s965_s28 = sshll.u32 %s365_s12, 3  ;;  %v1207_v46 = vpack.c.bf16 %v387_v43, %v386_v42  ;;  %v1209_v47 = vpack.c.bf16 %v405_v45, %v404_v44  ;;  %v388_v48 = vld [vmem:[%s1864_s2 + $0x70] sm:$0xff]  ;;  %v389_v49 = vld [vmem:[%s1864_s2 + $0x78] sm:$0xff]  ;;  %v520_v51 = vld [vmem:[%s1867_s5] sm:$0xff]  ;;  %s1337_s29 = sshll.u32 %s1400_s17, 4  ;;  %s1338_s29 = int_to_ptr.vmem [resolvable:$false] %s1337_s29 }
  0x19   : > { %s367_s21 = scalar_lea.vmem %s1862_s0, %s965_s28  ;;  %s371_s26 = scalar_lea.vmem %s1863_s1, %s965_s28  ;;  %v1211_v50 = vpack.c.bf16 %v389_v49, %v388_v48  ;;  %v521_v52 = vld [vmem:[%s1867_s5 + $0x8] sm:$0xff]  ;;  %v522_v55 = vld [vmem:[%s1867_s5 + $0x10] sm:$0xff]  ;;  %v523_v56 = vld [vmem:[%s1867_s5 + $0x18] sm:$0xff]  ;;  %v504_v37 = vshrl.u32 %v503_v36, 7 }
  0x1a   : > { %v372_v25 = vld [vmem:[%s367_s21] sm:$0xff]  ;;  %1192 = vmatpush3.bf16.msra.mxu0 %v1191_v19  ;;  %v1214_v53 = vpack.c.bf16 %v521_v52, %v520_v51  ;;  %v1217_v57 = vpack.c.bf16 %v523_v56, %v522_v55  ;;  %v525_v59 = vld [vmem:[%s1867_s5 + $0x28] sm:$0xff]  ;;  %v526_v61 = vld [vmem:[%s1867_s5 + $0x30] sm:$0xff]  ;;  %s361_s21 = sand.u32 1, %s1387_s14  }
  0x1b   : > { %v373_v26 = vld [vmem:[%s371_s26] sm:$0xff]  ;;  %1194 = vmatprep.subr.bf16.mxu0 %v1193_v20  ;;  %v527_v62 = vld [vmem:[%s1867_s5 + $0x38] sm:$0xff]  ;;  %v529_v2 = vld [vmem:[%s1867_s5 + $0x48] sm:$0xff]  ;;  %v1675_v39 = vsub.s32 0, %v504_v37  ;;  %s964_s26 = sshll.u32 %s361_s21, 3  ;;  %s876_s12 = scalar_lea.sflag [#allocation3], %s361_s21 }
  0x1c   : > { %470 = vmatprep.mubr.f32.mxu0 %v373_v26  ;;  %v1566_v28 = vadd.f32 %v373_v26, %v372_v25  ;;  %1215 = vmatpush3.bf16.msra.mxu1 %v1214_v53  ;;  %v524_v58 = vld [vmem:[%s1867_s5 + $0x20] sm:$0xff]  ;;  %v1223_v63 = vpack.c.bf16 %v527_v62, %v526_v61  ;;  %v530_v4 = vld [vmem:[%s1867_s5 + $0x50] sm:$0xff]  ;;  %v531_v5 = vld [vmem:[%s1867_s5 + $0x58] sm:$0xff]  ;;  %s363_s22 = scalar_lea.vmem [#allocation2], %s964_s26  ;;  %s1339_s26 = scalar_lea.vmem %s1338_s29, 256 }
  0x1d   : > { %1216 = vmatprep.subr.bf16.mxu1 %v1397_v54  ;;  %v1220_v60 = vpack.c.bf16 %v525_v59, %v524_v58  ;;  %v528_v1 = vld [vmem:[%s1867_s5 + $0x40] sm:$0xff]  ;;  %v1229_v6 = vpack.c.bf16 %v531_v5, %v530_v4  ;;  %v533_v8 = vld [vmem:[%s1867_s5 + $0x68] sm:$0xff]  ;;  %v534_v10 = vld [vmem:[%s1867_s5 + $0x70] sm:$0xff]  ;;  %s889_s20 = sshll.u32 %s363_s22, 4  ;;  %s1822_s20 = int_to_ptr.vmem [resolvable:$true] %s889_s20 }
  0x1e   : > { %1196 = vmatpush3.bf16.msra.mxu0 %v1195_v27  ;;  %v1226_v3 = vpack.c.bf16 %v529_v2, %v528_v1  ;;  %v532_v7 = vld [vmem:[%s1867_s5 + $0x60] sm:$0xff]  ;;  %v535_v11 = vld [vmem:[%s1867_s5 + $0x78] sm:$0xff]  ;;  %v968_v52 = vld [vmem:[%s1867_s5 + $0x88] sm:$0xff]  ;;  %s1333_s27 = scalar_lea.vmem %s1822_s20, 128  ;;  %p1340_p0 = scmp.lt.s32.totalorder %s1822_s20, %s1338_s29 }
  0x1f   : > { %1198 = vmatprep.subr.bf16.mxu0 %v1197_v29  ;;  %v1232_v9 = vpack.c.bf16 %v533_v8, %v532_v7  ;;  %v1235_v12 = vpack.c.bf16 %v535_v11, %v534_v10  ;;  %v476_v38 = vld [vmem:[%s1865_s3] sm:$0x1]  ;;  %v969_v55 = vld [vmem:[%s1867_s5 + $0x90] sm:$0xff]  ;;  %v970_v56 = vld [vmem:[%s1867_s5 + $0x98] sm:$0xff]  ;;  %p1334_p11 = scmp.ne.s32.totalorder %s1822_s20, %s1333_s27  ;;  %p1341_p1 = scmp.lt.s32.totalorder %s1339_s26, %s1333_s27 }
  0x20   : > { %1218 = vmatpush3.bf16.msra.mxu1 %v1217_v57  ;;  %v477_v42 = vld [vmem:[%s1866_s4] sm:$0x1]  ;;  %v1241_v57 = vpack.c.bf16 %v970_v56, %v969_v55  ;;  %v972_v59 = vld [vmem:[%s1867_s5 + $0xa8] sm:$0xff]  ;;  %v973_v61 = vld [vmem:[%s1867_s5 + $0xb0] sm:$0xff] }
  0x21   : > { %1219 = vmatprep.subr.bf16.mxu1 %v1397_v54  ;;  %v967_v51 = vld [vmem:[%s1867_s5 + $0x80] sm:$0xff]  ;;  %v974_v62 = vld [vmem:[%s1867_s5 + $0xb8] sm:$0xff]  ;;  %v976_v1 = vld [vmem:[%s1867_s5 + $0xc8] sm:$0xff]  ;;  %p1335_p12 = pnand %p1334_p11, %p1494_p5  ;;  %p1342_p2 = por %p1341_p1, %p1340_p0 }
  0x22   : > { %1200 = vmatpush3.bf16.msra.mxu0 %v1199_v34  ;;  %v1238_v53 = vpack.c.bf16 %v968_v52, %v967_v51  ;;  %v971_v58 = vld [vmem:[%s1867_s5 + $0xa0] sm:$0xff]  ;;  %v978_v4 = vld [vmem:[%s1867_s5 + $0xd8] sm:$0xff]  ;;  %v980_v7 = vld [vmem:[%s1867_s5 + $0xe8] sm:$0xff] }
  0x23   : > { %1202 = vmatprep.subr.bf16.mxu0 %v1201_v35  ;;  %v982_v10 = vld [vmem:[%s1867_s5 + $0xf8] sm:$0xff]  ;;  %v607_v37 = vld [vmem:[%s1869_s7] sm:$0x1]  ;;  %v783_v51 = vld [vmem:[%s1870_s8 + $0x10] sm:$0xff]  ;;  %p1336_p13 = pneg %p1335_p12 }
  0x24   : > { %1221 = vmatpush3.bf16.msra.mxu1 %v1220_v60  ;;  %v1244_v60 = vpack.c.bf16 %v972_v59, %v971_v58  ;;  %v784_v52 = vld [vmem:[%s1870_s8 + $0x18] sm:$0xff]  ;;  %v785_v55 = vld [vmem:[%s1870_s8 + $0x20] sm:$0xff]  ;;  %v786_v56 = vld [vmem:[%s1870_s8 + $0x28] sm:$0xff] }
  0x25   : > { %1222 = vmatprep.subr.bf16.mxu1 %v1397_v54  ;;  %v787_v58 = vld [vmem:[%s1870_s8 + $0x30] sm:$0xff]  ;;  %v788_v59 = vld [vmem:[%s1870_s8 + $0x38] sm:$0xff]  ;;  %p1343_p3 = pnand %p1342_p2, %p1336_p13 }
  0x26   : > { %1204 = vmatpush3.bf16.msra.mxu0 %v1203_v40 }
  0x27   : > { %1206 = vmatprep.subr.bf16.mxu0 %v1205_v41 }
  0x28   : > { %1224 = vmatpush3.bf16.msra.mxu1 %v1223_v63  ;;  %v1247_v63 = vpack.c.bf16 %v974_v62, %v973_v61  ;;  %v789_v61 = vld [vmem:[%s1870_s8 + $0x40] sm:$0xff]  ;;  %v790_v62 = vld [vmem:[%s1870_s8 + $0x48] sm:$0xff] }
  0x29   : > { %1225 = vmatprep.subr.bf16.mxu1 %v1397_v54 }
  0x2a   : > { %1208 = vmatpush3.bf16.msra.mxu0 %v1207_v46 }
  0x2b   : > { %1210 = vmatprep.subr.bf16.mxu0 %v1209_v47 }
  0x2c   : > { %1227 = vmatpush3.bf16.msra.mxu1 %v1226_v3  ;;  %v977_v3 = vld [vmem:[%s1867_s5 + $0xd0] sm:$0xff] }
  0x2d   : > { %1228 = vmatprep.subr.bf16.mxu1 %v1397_v54  ;;  %v1253_v5 = vpack.c.bf16 %v978_v4, %v977_v3  ;;  %v793_v3 = vld [vmem:[%s1870_s8 + $0x60] sm:$0xff]  ;;  %v794_v4 = vld [vmem:[%s1870_s8 + $0x68] sm:$0xff] }
  0x2e   : > { %1212 = vmatpush3.bf16.msra.mxu0 %v1211_v50 }
  0x2f   : > { %1237 = vmatprep.subr.bf16.mxu0 %v1397_v54 }
  0x30   : > { %1230 = vmatpush3.bf16.msra.mxu1 %v1229_v6  ;;  %v979_v6 = vld [vmem:[%s1867_s5 + $0xe0] sm:$0xff] }
  0x31   : > { %471 = vmatmul.mubr.f32.vlgmr.msra.gmra.mrb[0].mxu0 %v372_v25  ;;  %1231 = vmatprep.subr.bf16.mxu1 %v1397_v54  ;;  %v1256_v8 = vpack.c.bf16 %v980_v7, %v979_v6  ;;  %v795_v6 = vld [vmem:[%s1870_s8 + $0x70] sm:$0xff]  ;;  %v796_v7 = vld [vmem:[%s1870_s8 + $0x78] sm:$0xff] }
  0x32   : > { %1143 = vmatprep.mubr.msk.f32.mxu0 %vm1398_vm0, %v1399_v0  ;;  %1239 = vmatpush3.bf16.msra.mxu0 %v1238_v53  ;;  %v1265_v53 = vpack.c.bf16 %v784_v52, %v783_v51 }
  0x33   : > { %1240 = vmatprep.subr.bf16.mxu0 %v1397_v54 }
  0x34   : > { %1233 = vmatpush3.bf16.msra.mxu1 %v1232_v9  ;;  %v981_v9 = vld [vmem:[%s1867_s5 + $0xf0] sm:$0xff] }
  0x35   : > { %1234 = vmatprep.subr.bf16.mxu1 %v1397_v54  ;;  %v1259_v11 = vpack.c.bf16 %v982_v10, %v981_v9 }
  0x36   : > { %1242 = vmatpush3.bf16.msra.mxu0 %v1241_v57  ;;  %v1268_v57 = vpack.c.bf16 %v786_v56, %v785_v55 }
  0x37   : > { %1243 = vmatprep.subr.bf16.mxu0 %v1397_v54 }
  0x38   : > { %1236 = vmatpush3.bf16.msra.mxu1 %v1235_v12 }
  0x39   : > { %1261 = vmatprep.subr.bf16.mxu1 %v1397_v54 }
  0x3a   : > { %1245 = vmatpush3.bf16.msra.mxu0 %v1244_v60  ;;  %v1271_v60 = vpack.c.bf16 %v788_v59, %v787_v58 }
  0x3b   : > { %1246 = vmatprep.subr.bf16.mxu0 %v1397_v54 }
  0x3e   : > { %1248 = vmatpush3.bf16.msra.mxu0 %v1247_v63  ;;  %v1274_v63 = vpack.c.bf16 %v790_v62, %v789_v61 }
  0x3f   : > { %1249 = vmatprep.subr.bf16.mxu0 %v1397_v54 }
 0x104   : > { %v1022_v13 = vpop.f32.mrb[0].mxu0 }
 0x105   : > { %v1023_v14 = vpop.f32.mrb[1].mxu0 }
 0x106   : > { %v1024_v15 = vadd.f32 %v1023_v14, %v1022_v13 }
 0x108   : > { %v478_v16 = vrot.slane %v1024_v15, 4  ;;  %v486_v17 = vmul.f32 %v1024_v15, %v1024_v15 }
 0x10a   : > { %v479_v18 = vadd.f32 %v1024_v15, %v478_v16  ;;  %v487_v19 = vrot.slane %v486_v17, 4 }
 0x10c   : > { %v480_v20 = vrot.slane %v479_v18, 2  ;;  %v488_v21 = vadd.f32 %v487_v19, %v486_v17 }
 0x10e   : > { %v481_v22 = vadd.f32 %v480_v20, %v479_v18  ;;  %v489_v23 = vrot.slane %v488_v21, 2 }
 0x110   : > { %v482_v24 = vrot.slane %v481_v22, 1  ;;  %v490_v25 = vadd.f32 %v489_v23, %v488_v21 }
 0x112   : > { %v483_v26 = vadd.f32 %v482_v24, %v481_v22  ;;  %v491_v27 = vrot.slane %v490_v25, 1 }
 0x114   : > { %v485_v29 = vmul.f32 0.125, %v483_v26  ;;  %v492_v30 = vadd.f32 %v491_v27, %v490_v25 }
 0x116   : > { %v493_v31 = vmul.f32 0.125, %v492_v30  ;;  %v494_v32 = vmul.f32 %v485_v29, %v485_v29 }
 0x118   : > { %v495_v33 = vsub.f32 %v493_v31, %v494_v32 }
 0x11a   : > { %v496_v34 = vmax.f32 %v495_v33, 0.0 }
 0x11c   : > { %v497_v35 = vadd.f32 1e-05, %v496_v34  ;;  %v606_v34 = vld [vmem:[%s1868_s6] sm:$0x1] }
 0x11e   : > { %1327 = vrsqrt.f32 %v497_v35 }
 0x128   : > { %v1328_v40 = vpop.eup %1327 }
 0x129   : > { %v499_v41 = vmul.f32 %v1328_v40, %v476_v38 }
 0x12b   : > { %v500_v43 = vmul.f32 %v499_v41, %v485_v29  ;;  %v506_v44 = vrot.slane %v499_v41, %v1675_v39 }
 0x12d   : > { %v501_v45 = vsub.f32 %v477_v42, %v500_v43  ;;  %v508_v46 = vmul.f32 %v1024_v15, %v506_v44 }
 0x12f   : > { %v513_v47 = vrot.slane %v501_v45, %v1675_v39 }
 0x131   : > { %v515_v48 = vadd.f32 %v513_v47, %v508_v46 }
 0x133   : > { %vm516_vm1 = vcmp.gt.f32.partialorder %v515_v48, 0.0  ;;  %v517_v49 = vmul.f32 0.2, %v515_v48 }
 0x135   : > { %v518_v50 = vsel %vm516_vm1, %v515_v48, %v517_v49  ;;  %v781_v48 = vld [vmem:[%s1870_s8] sm:$0xff]  ;;  %v782_v49 = vld [vmem:[%s1870_s8 + $0x8] sm:$0xff] }
 0x136   : > { %1109 = vmatmul.mubr.f32.vlgmr.msra.gmra.mrb[0].mxu1 %v518_v50  ;;  %v1262_v50 = vpack.c.bf16 %v782_v49, %v781_v48 }
 0x137   : > { %1178 = vmatprep.mubr.msk.f32.mxu1 %vm1398_vm0, %v1399_v0  ;;  %v975_v0 = vld [vmem:[%s1867_s5 + $0xc0] sm:$0xff] }
 0x138   : > { %v1250_v2 = vpack.c.bf16 %v976_v1, %v975_v0  ;;  %1263 = vmatpush3.bf16.msra.mxu1 %v1262_v50  ;;  %v791_v0 = vld [vmem:[%s1870_s8 + $0x50] sm:$0xff]  ;;  %v792_v1 = vld [vmem:[%s1870_s8 + $0x58] sm:$0xff] }
 0x139   : > { %1264 = vmatprep.subr.bf16.mxu1 %v1397_v54 }
 0x13a   : > { %1251 = vmatpush3.bf16.msra.mxu0 %v1250_v2  ;;  %v1277_v2 = vpack.c.bf16 %v792_v1, %v791_v0 }
 0x13b   : > { %1252 = vmatprep.subr.bf16.mxu0 %v1397_v54 }
 0x13c   : > { %1266 = vmatpush3.bf16.msra.mxu1 %v1265_v53 }
 0x13d   : > { %1267 = vmatprep.subr.bf16.mxu1 %v1397_v54 }
 0x13e   : > { %1254 = vmatpush3.bf16.msra.mxu0 %v1253_v5  ;;  %v1280_v5 = vpack.c.bf16 %v794_v4, %v793_v3 }
 0x13f   : > { %1255 = vmatprep.subr.bf16.mxu0 %v1397_v54 }
 0x140   : > { %1269 = vmatpush3.bf16.msra.mxu1 %v1268_v57 }
 0x141   : > { %1270 = vmatprep.subr.bf16.mxu1 %v1397_v54 }
 0x142   : > { %1257 = vmatpush3.bf16.msra.mxu0 %v1256_v8  ;;  %v1283_v8 = vpack.c.bf16 %v796_v7, %v795_v6 }
 0x143   : > { %1258 = vmatprep.subr.bf16.mxu0 %v1397_v54 }
 0x144   : > { %1272 = vmatpush3.bf16.msra.mxu1 %v1271_v60 }
 0x145   : > { %1273 = vmatprep.subr.bf16.mxu1 %v1397_v54 }
 0x146   : > { %1260 = vmatpush3.bf16.msra.mxu0 %v1259_v11 }
 0x148   : > { %1275 = vmatpush3.bf16.msra.mxu1 %v1274_v63 }
 0x149   : > { %1276 = vmatprep.subr.bf16.mxu1 %v1397_v54 }
 0x14c   : > { %1278 = vmatpush3.bf16.msra.mxu1 %v1277_v2 }
 0x14d   : > { %1279 = vmatprep.subr.bf16.mxu1 %v1397_v54 }
 0x150   : > { %1281 = vmatpush3.bf16.msra.mxu1 %v1280_v5 }
 0x151   : > { %1282 = vmatprep.subr.bf16.mxu1 %v1397_v54 }
 0x154   : > { %1284 = vmatpush3.bf16.msra.mxu1 %v1283_v8 }
 0x209   : > { %v602_v12 = vpop.f32.mrb[0].mxu1 }
 0x20a   : > { %v608_v13 = vrot.slane %v602_v12, 4  ;;  %v615_v14 = vmul.f32 %v602_v12, %v602_v12  ;;  %v1110_v15 = vpop.f32.mrb[1].mxu1 }
 0x20c   : > { %v609_v16 = vadd.f32 %v608_v13, %v602_v12  ;;  %v616_v17 = vrot.slane %v615_v14, 4 }
 0x20e   : > { %v610_v18 = vrot.slane %v609_v16, 2  ;;  %v617_v19 = vadd.f32 %v616_v17, %v615_v14 }
 0x210   : > { %v611_v20 = vadd.f32 %v610_v18, %v609_v16  ;;  %v618_v21 = vrot.slane %v617_v19, 2 }
 0x212   : > { %v612_v22 = vrot.slane %v611_v20, 1  ;;  %v619_v23 = vadd.f32 %v618_v21, %v617_v19 }
 0x214   : > { %v613_v24 = vadd.f32 %v612_v22, %v611_v20  ;;  %v620_v25 = vrot.slane %v619_v23, 1 }
 0x216   : > { %v614_v26 = vmul.f32 0.125, %v613_v24  ;;  %v621_v27 = vadd.f32 %v620_v25, %v619_v23 }
 0x218   : > { %v622_v29 = vmul.f32 0.125, %v621_v27  ;;  %v623_v30 = vmul.f32 %v614_v26, %v614_v26 }
 0x21a   : > { %v624_v31 = vsub.f32 %v622_v29, %v623_v30  ;;  %v983_v30 = vld [vmem:[%s1868_s6 + $0x1] sm:$0x1] }
 0x21c   : > { %v625_v32 = vmax.f32 %v624_v31, 0.0 }
 0x21e   : > { %v626_v33 = vadd.f32 1e-05, %v625_v32 }
 0x220   : > { %1329 = vrsqrt.f32 %v626_v33  ;;  %v984_v33 = vld [vmem:[%s1869_s7 + $0x1] sm:$0x1] }
 0x22a   : > { %v1330_v35 = vpop.eup %1329 }
 0x22b   : > { %v628_v36 = vmul.f32 %v1330_v35, %v606_v34 }
 0x22d   : > { %v629_v38 = vmul.f32 %v628_v36, %v614_v26  ;;  %v635_v40 = vrot.slane %v628_v36, %v1675_v39 }
 0x22f   : > { %v630_v41 = vsub.f32 %v607_v37, %v629_v38  ;;  %v637_v42 = vmul.f32 %v635_v40, %v602_v12 }
 0x231   : > { %v642_v43 = vrot.slane %v630_v41, %v1675_v39 }
 0x233   : > { %v644_v44 = vadd.f32 %v642_v43, %v637_v42 }
 0x235   : > { %v645_v45 = vadd.f32 %v644_v44, %v1566_v28  ;;  %v985_v44 = vld [vmem:[%s1871_s9] ss:$0 sm:$0xff] }
 0x237   : > { %vm646_vm2 = vcmp.gt.f32.partialorder %v645_v45, 0.0  ;;  %v647_v46 = vmul.f32 0.2, %v645_v45 }
 0x239   : > { %v648_v47 = vsel %vm646_vm2, %v645_v45, %v647_v46 }
 0x23a   : > { %1144 = vmatmul.mubr.f32.vlgmr.msra.gmra.mrb[2].mxu0 %v648_v47 }
 0x30d   : > { %v732_v9 = vpop.f32.mrb[2].mxu0 }
 0x30e   : > { %v740_v10 = vrot.slane %v732_v9, 4  ;;  %v747_v11 = vmul.f32 %v732_v9, %v732_v9  ;;  %v1145_v12 = vpop.f32.mrb[3].mxu0 }
 0x310   : > { %v741_v13 = vadd.f32 %v740_v10, %v732_v9  ;;  %v748_v14 = vrot.slane %v747_v11, 4 }
 0x312   : > { %v742_v15 = vrot.slane %v741_v13, 2  ;;  %v749_v16 = vadd.f32 %v748_v14, %v747_v11 }
 0x314   : > { %v743_v17 = vadd.f32 %v742_v15, %v741_v13  ;;  %v750_v18 = vrot.slane %v749_v16, 2 }
 0x316   : > { %v744_v19 = vrot.slane %v743_v17, 1  ;;  %v751_v20 = vadd.f32 %v750_v18, %v749_v16 }
 0x318   : > { %v745_v21 = vadd.f32 %v744_v19, %v743_v17  ;;  %v752_v22 = vrot.slane %v751_v20, 1 }
 0x31a   : > { %v746_v23 = vmul.f32 0.125, %v745_v21  ;;  %v753_v24 = vadd.f32 %v752_v22, %v751_v20 }
 0x31c   : > { %v754_v25 = vmul.f32 0.125, %v753_v24  ;;  %v755_v54 = vmul.f32 %v746_v23, %v746_v23 }
 0x31e   : > { %v756_v26 = vsub.f32 %v754_v25, %v755_v54 }
 0x320   : > { %v757_v27 = vmax.f32 %v756_v26, 0.0 }
 0x322   : > { %v758_v29 = vadd.f32 1e-05, %v757_v27 }
 0x324   : > { %1331 = vrsqrt.f32 %v758_v29 }
 0x32e   : > { %v1332_v31 = vpop.eup %1331 }
 0x32f   : > { %v760_v32 = vmul.f32 %v1332_v31, %v983_v30 }
 0x331   : > { %v761_v34 = vmul.f32 %v760_v32, %v746_v23  ;;  %v767_v35 = vrot.slane %v760_v32, %v1675_v39 }
 0x333   : > { %v762_v36 = vsub.f32 %v984_v33, %v761_v34  ;;  %v769_v37 = vmul.f32 %v767_v35, %v732_v9 }
 0x335   : > { %v774_v38 = vrot.slane %v762_v36, %v1675_v39 }
 0x337   : > { %v776_v40 = vadd.f32 %v774_v38, %v769_v37 }
 0x339   : > { %v777_v41 = vadd.f32 %v776_v40, %v1566_v28 }
 0x33b   : > { %vm778_vm3 = vcmp.gt.f32.partialorder %v777_v41, 0.0  ;;  %v779_v42 = vmul.f32 0.2, %v777_v41 }
 0x33d   : > { %v780_v43 = vsel %vm778_vm3, %v777_v41, %v779_v42 }
 0x33e   : > { %1179 = vmatmul.mubr.f32.vlgmr.msra.gmra.mrb[2].mxu1 %v780_v43 }
 0x411   : > { %v870_v45 = vpop.f32.mrb[2].mxu1 }
 0x412   : > { %v871_v46 = vadd.f32 %v985_v44, %v870_v45  ;;  %v1180_v39 = vpop.f32.mrb[3].mxu1 }
 0x414   : > { %874 = vst [vmem:[%s363_s22] sm:$0xff] %v871_v46 }
 0x415   : > { %1346 = shalt.err (!%p1343_p3)
}
 0x416   : > { %s1347_s21 = scalar_lea.hbm %s1820_s25, 128  ;;  %s1351_s18 = scalar_lea.hbm %s1872_s10, 256 }
 0x417   : > { %p1348_p4 = scmp.ne.s32.totalorder %s1820_s25, %s1347_s21  ;;  %p1352_p9 = scmp.lt.u32.totalorder %s1820_s25, %s1872_s10 }
 0x418   : > { %p1353_p10 = scmp.lt.u32.totalorder %s1351_s18, %s1347_s21  ;;  %p1355_p12 = scmp.lt.u32.totalorder %s1347_s21, %s1820_s25 }
 0x419   : > { %p1349_p7 = pnand %p1348_p4, %p1494_p5 }
 0x41a   : > { %p1354_p11 = por %p1353_p10, %p1352_p9 }
 0x41b   : > { %p1350_p8 = pneg %p1349_p7 }
 0x41c   : > { %p1356_p13 = por %p1355_p12, %p1354_p11 }
 0x41e   : > { %p1357_p0 = pnand %p1356_p13, %p1350_p8 }
 0x420   : > { %1360 = shalt.err (!%p1357_p0)
}
 0x421   : > { %1285 = dma.vmem_to_hbm [thread:$0]  (%p1494_p5), %s1822_s20, 128, %s1820_s25, %s876_s12  }
 0x422 PF: > { %p1291_p1 = scmp.ge.s32.totalorder %s1395_s16, 2  ;;  %s901_s28 = sand.u32 1, %s1383_s13  }
 0x423   : > { %s902_s27 = scalar_lea.sflag [#allocation3], %s901_s28 }
 0x424   : > { %p1288_p2 = pnand %p1291_p1, %p1498_p6 }
 0x426   : > { %1378 = dma.done.wait (!%p1288_p2), %s902_s27, 128  }
 0x427   : > { %1380 = vsyncadd (!%p1288_p2), %s902_s27, 4294967168  ;;  %s1878_s17 = sld [smem:[#allocation5_spill]]  ;;  %s1879_s15 = sld [smem:[#allocation6_spill]] }
 0x428   : > { %p20_p3 = scmp.ge.s32.totalorder %s1481_s19, 4   ;;  %s1880_s13 = smov %s1387_s14 }
 0x429   : > { %s1882_s16 = smov %s1481_s19 }
 0x42a   :  { %22 = sbr.rel (!%p20_p3) target bundleno = 3 (0x3), region = 101 }
 0x42d   : > { %s1881_s14 = smov %s1878_s17 }
 0x431   :  { %907 = vsyncpa [#allocation3], 1 }
 0x432   :  { %909 = vsyncpa [#allocation3 + $0x1], 1 }

</bundles_post_ra>
